<compile_context>
chip_gen: v7x
topology: tpu7x:2x2x1
jax: 0.10.0
libtpu: 0.0.40
codegen_flags: <defaults>
</compile_context>

<pallas_src>
import functools
import math

import jax
import jax.numpy as jnp
from jax.experimental import pallas as pl
from jax.experimental.pallas import tpu as pltpu


def _round_up(x, m):
    return ((x + m - 1) // m) * m


def _vmem_capacity_bytes():
    try:
        return int(pltpu.get_tpu_info().vmem_capacity_bytes)
    except Exception:
        return 64 << 20  # conservative default (v7x per-TC VMEM)


# --------------------------------- kernels -----------------------------------

def _ffn_resident_kernel(x_ref, w1_ref, w2_ref, o_ref, *, compute_dtype):
    # x_ref : (tm, d_model)   token tile in input dtype (pipelined)
    # w1_ref: (d_model, d_ff) compute_dtype, pre-transposed, whole in VMEM
    # w2_ref: (d_ff, d_model) compute_dtype, pre-transposed, whole in VMEM
    x = x_ref[...].astype(compute_dtype)              # per-tile cast on the VPU
    h = jnp.dot(x, w1_ref[...], preferred_element_type=jnp.float32)
    h = jnp.maximum(h, 0.0)                           # ReLU
    # Dropout1d: eval-mode identity.
    y = jnp.dot(h.astype(compute_dtype), w2_ref[...],
                preferred_element_type=jnp.float32)
    o_ref[...] = y.astype(o_ref.dtype)


def _ffn_tiled_kernel(x_ref, w1_ref, w2_ref, o_ref, acc_ref, *, compute_dtype):
    # grid = (token tiles, d_ff tiles); d_ff is the inner reduction axis.
    # x_ref : (tm, d_model); w1_ref: (d_model, tf); w2_ref: (tf, d_model)
    # acc_ref: (tm, d_model) f32 scratch accumulator.
    k = pl.program_id(1)

    @pl.when(k == 0)
    def _():
        acc_ref[...] = jnp.zeros_like(acc_ref)

    x = x_ref[...].astype(compute_dtype)
    h = jnp.dot(x, w1_ref[...], preferred_element_type=jnp.float32)    # (tm, tf)
    h = jnp.maximum(h, 0.0)                  # ReLU is elementwise in d_ff: tiling-safe
    acc_ref[...] += jnp.dot(h.astype(compute_dtype), w2_ref[...],
                            preferred_element_type=jnp.float32)

    @pl.when(k == pl.num_programs(1) - 1)
    def _():
        o_ref[...] = acc_ref[...].astype(o_ref.dtype)


# ----------------------------- VMEM estimates --------------------------------

def _resident_vmem_est(tm, d_model, d_ff, in_size, csize, osize):
    return (2 * d_model * d_ff * csize        # w1_t + w2_t, single copy
            + 2 * tm * d_model * in_size      # x tile, double-buffered
            + 2 * tm * d_model * osize        # out tile, double-buffered
            + tm * d_ff * (4 + csize)         # h f32 + compute-dtype copy
            + tm * d_model * 4)               # y f32


def _tiled_vmem_est(tm, tf, d_model, in_size, csize, osize):
    return (2 * 2 * d_model * tf * csize      # w1/w2 tiles, double-buffered
            + 2 * tm * d_model * in_size      # x tile, double-buffered
            + 2 * tm * d_model * osize        # out tile, double-buffered
            + tm * tf * (4 + csize)           # h f32 + compute-dtype copy
            + tm * d_model * 4)               # f32 accumulator scratch


# ------------------------------ jitted impls ---------------------------------

@functools.partial(jax.jit, static_argnames=("tm", "compute_dtype", "vmem_limit"))
def _ffn_resident(x2d, w1, w2, *, tm, compute_dtype, vmem_limit):
    M, d_model = x2d.shape
    d_ff = w1.shape[0]
    csize = jnp.dtype(compute_dtype).itemsize
    osize = x2d.dtype.itemsize

    # One-time HBM-side transpose fused with the dtype cast:
    # PyTorch (out, in) layout -> (in, out) so the kernel contracts the RHS
    # second-to-last dim (no in-kernel XLU transposes).
    w1_t = w1.T.astype(compute_dtype)                 # (d_model, d_ff)
    w2_t = w2.T.astype(compute_dtype)                 # (d_ff, d_model)

    num_m = pl.cdiv(M, tm)
    flops = 4 * num_m * tm * d_model * d_ff
    bytes_accessed = (M * d_model * x2d.dtype.itemsize
                      + 2 * d_model * d_ff * csize
                      + M * d_model * osize)

    kernel = functools.partial(_ffn_resident_kernel, compute_dtype=compute_dtype)
    return pl.pallas_call(
        kernel,
        out_shape=jax.ShapeDtypeStruct((M, d_model), x2d.dtype),
        grid_spec=pltpu.PrefetchScalarGridSpec(
            num_scalar_prefetch=0,
            grid=(num_m,),
            in_specs=[
                # Token tile: pipelined over the grid.
                pl.BlockSpec((tm, d_model), lambda i: (i, 0)),
                # Weights: whole arrays resident in VMEM, single copy.
                pl.BlockSpec(memory_space=pltpu.MemorySpace.VMEM),
                pl.BlockSpec(memory_space=pltpu.MemorySpace.VMEM),
            ],
            out_specs=pl.BlockSpec((tm, d_model), lambda i: (i, 0)),
        ),
        compiler_params=pltpu.CompilerParams(
            dimension_semantics=("parallel",),
            vmem_limit_bytes=vmem_limit),
        cost_estimate=pl.CostEstimate(flops=flops, transcendentals=0,
                                      bytes_accessed=bytes_accessed),
    )(x2d, w1_t, w2_t)


@functools.partial(jax.jit,
                   static_argnames=("tm", "tf", "d_ff_pad", "compute_dtype",
                                    "vmem_limit"))
def _ffn_tiled(x2d, w1, w2, *, tm, tf, d_ff_pad, compute_dtype, vmem_limit):
    M, d_model = x2d.shape
    d_ff = w1.shape[0]
    csize = jnp.dtype(compute_dtype).itemsize
    osize = x2d.dtype.itemsize

    # Transpose + cast (+ zero-pad the reduction dim: zeros are exact no-ops
    # through relu/matmul) in one fused wrapper pass.
    w1_t = w1.T.astype(compute_dtype)                 # (d_model, d_ff)
    w2_t = w2.T.astype(compute_dtype)                 # (d_ff, d_model)
    if d_ff_pad != d_ff:
        w1_t = jnp.pad(w1_t, ((0, 0), (0, d_ff_pad - d_ff)))
        w2_t = jnp.pad(w2_t, ((0, d_ff_pad - d_ff), (0, 0)))

    num_m = pl.cdiv(M, tm)
    nf = d_ff_pad // tf
    flops = 4 * num_m * tm * d_model * d_ff_pad
    bytes_accessed = (M * d_model * x2d.dtype.itemsize
                      + num_m * 2 * d_model * d_ff_pad * csize  # weights re-streamed
                      + M * d_model * osize)

    kernel = functools.partial(_ffn_tiled_kernel, compute_dtype=compute_dtype)
    return pl.pallas_call(
        kernel,
        out_shape=jax.ShapeDtypeStruct((M, d_model), x2d.dtype),
        grid_spec=pltpu.PrefetchScalarGridSpec(
            num_scalar_prefetch=0,
            grid=(num_m, nf),
            in_specs=[
                pl.BlockSpec((tm, d_model), lambda i, k: (i, 0)),
                pl.BlockSpec((d_model, tf), lambda i, k: (0, k)),
                pl.BlockSpec((tf, d_model), lambda i, k: (k, 0)),
            ],
            out_specs=pl.BlockSpec((tm, d_model), lambda i, k: (i, 0)),
            scratch_shapes=[pltpu.VMEM((tm, d_model), jnp.float32)],
        ),
        compiler_params=pltpu.CompilerParams(
            dimension_semantics=("parallel", "arbitrary"),
            vmem_limit_bytes=vmem_limit),
        cost_estimate=pl.CostEstimate(flops=flops, transcendentals=0,
                                      bytes_accessed=bytes_accessed),
    )(x2d, w1_t, w2_t)


# ------------------------------ public wrapper --------------------------------

def pointwise_ffn(x, w1, w2, *, tm=512, compute_dtype=jnp.bfloat16):
    """x: (..., d_model); w1: (d_ff, d_model); w2: (d_model, d_ff) (PyTorch layout)."""
    orig_shape = x.shape
    d_model = orig_shape[-1]
    d_ff = w1.shape[0]
    assert w1.shape == (d_ff, d_model), "w1 must be (d_ff, d_model)"
    assert w2.shape == (d_model, d_ff), "w2 must be (d_model, d_ff)"
    M = math.prod(orig_shape[:-1]) if len(orig_shape) > 1 else 1

    in_size = jnp.dtype(x.dtype).itemsize
    csize = jnp.dtype(compute_dtype).itemsize
    osize = in_size  # output dtype == input dtype

    cap = _vmem_capacity_bytes()
    budget = min(cap - (8 << 20), int(cap * 0.85))    # leave compiler headroom

    # Token tile: obey the (8,128) rule and don't exceed the token count.
    tm = _round_up(max(8, min(tm, _round_up(M, 8))), 8)

    x2d = x.reshape(M, d_model)   # no pad / no dtype pre-pass over activations

    res_est = _resident_vmem_est(tm, d_model, d_ff, in_size, csize, osize)
    if res_est <= budget:
        vmem_limit = int(min(budget, max(32 << 20, 2 * res_est)))
        out2d = _ffn_resident(x2d, w1, w2, tm=tm, compute_dtype=compute_dtype,
                              vmem_limit=vmem_limit)
    else:
        # d_ff-tiled path: stream weight tiles over a reduction grid axis.
        tm_cands = [t for t in dict.fromkeys((tm, 256, 128)) if t <= tm] or [tm]
        tm_sel, tf_sel = None, None
        for cand_tm in tm_cands:
            for cand_tf in (4096, 2048, 1024, 512, 256, 128):
                if _tiled_vmem_est(cand_tm, cand_tf, d_model,
                                   in_size, csize, osize) <= budget:
                    tm_sel, tf_sel = cand_tm, cand_tf
                    break
            if tf_sel is not None:
                break
        if tf_sel is None:
            tm_sel, tf_sel = 128, 128   # last resort
        tm = tm_sel
        tf = min(tf_sel, _round_up(d_ff, 128))
        d_ff_pad = _round_up(d_ff, tf)
        est = _tiled_vmem_est(tm, tf, d_model, in_size, csize, osize)
        vmem_limit = int(min(budget, max(32 << 20, 2 * est)))
        out2d = _ffn_tiled(x2d, w1, w2, tm=tm, tf=tf, d_ff_pad=d_ff_pad,
                           compute_dtype=compute_dtype, vmem_limit=vmem_limit)

    return out2d.reshape(orig_shape)


if __name__ == "__main__":
    # Small shapes consistent with the module (d_model -> d_ff -> d_model).
    B, S, d_model, d_ff = 2, 64, 128, 512

    key = jax.random.PRNGKey(0)
    kx, k1, k2 = jax.random.split(key, 3)

    x = jax.random.normal(kx, (B, S, d_model), dtype=jnp.float32)
    # PyTorch Linear weight layout is (out_features, in_features).
    w1 = jax.random.normal(k1, (d_ff, d_model), dtype=jnp.float32) * (1.0 / d_model) ** 0.5
    w2 = jax.random.normal(k2, (d_model, d_ff), dtype=jnp.float32) * (1.0 / d_ff) ** 0.5

    out = pointwise_ffn(x, w1, w2)
    out = jax.block_until_ready(out)

    # Pure-JAX reference mirroring the kernel numerics (bf16 operands, f32
    # accumulation, eval-mode Dropout1d = identity).
    f32 = jnp.float32
    xb = x.astype(jnp.bfloat16).astype(f32)
    w1b = w1.astype(jnp.bfloat16).astype(f32)
    w2b = w2.astype(jnp.bfloat16).astype(f32)
    h_ref = jnp.maximum(xb @ w1b.T, 0.0).astype(jnp.bfloat16).astype(f32)
    ref = h_ref @ w2b.T

    assert out.shape == (B, S, d_model)
    assert out.dtype == x.dtype
    assert jnp.allclose(out, ref, atol=2e-2, rtol=2e-2), "mismatch vs reference"

    print("KERNEL_OK")
</pallas_src>

<mosaic_0001>
module attributes {stable_mosaic.version = 11 : i64} {
  func.func @_ffn_resident_kernel(%arg0: i32, %arg1: memref<128x128xf32, #tpu.memory_space<vmem>>, %arg2: memref<128x512xbf16, #tpu.memory_space<vmem>>, %arg3: memref<512x128xbf16, #tpu.memory_space<vmem>>, %arg4: memref<128x128xf32, #tpu.memory_space<vmem>>) attributes {dimension_semantics = [#tpu.dimension_semantics<parallel>], iteration_bounds = array<i64: 1>, scalar_prefetch = 0 : i64, scratch_operands = 0 : i64, tpu.core_type = #tpu.core_type<tc>, window_params = [{transform_indices = @transform_0, window_bounds = array<i64: 128, 128>}, {pipeline_mode = #tpu.pipeline_mode<synchronous>, transform_indices = @transform_1, window_bounds = array<i64: 128, 512>}, {pipeline_mode = #tpu.pipeline_mode<synchronous>, transform_indices = @transform_2, window_bounds = array<i64: 512, 128>}, {transform_indices = @transform_3, window_bounds = array<i64: 128, 128>}]} {
    %c0 = arith.constant 0 : index
    %c0_0 = arith.constant 0 : index
    %0 = vector.load %arg1[%c0, %c0_0] : memref<128x128xf32, #tpu.memory_space<vmem>>, vector<128x128xf32>
    %1 = arith.truncf %0 : vector<128x128xf32> to vector<128x128xbf16>
    %c0_1 = arith.constant 0 : index
    %c0_2 = arith.constant 0 : index
    %2 = vector.load %arg2[%c0_1, %c0_2] : memref<128x512xbf16, #tpu.memory_space<vmem>>, vector<128x512xbf16>
    %cst = arith.constant dense<0.000000e+00> : vector<128x512xf32>
    %3 = tpu.matmul %1, %2, %cst {dimension_numbers = #tpu.dot_dimension_numbers<[1], [0], [0], [1], [0, 0, 1, 1], [], []>} : vector<128x128xbf16>, vector<128x512xbf16>, vector<128x512xf32> -> vector<128x512xf32>
    %cst_3 = arith.constant 0.000000e+00 : f32
    %4 = vector.broadcast %cst_3 : f32 to vector<128x512xf32>
    %5 = arith.maximumf %3, %4 : vector<128x512xf32>
    %6 = arith.truncf %5 : vector<128x512xf32> to vector<128x512xbf16>
    %c0_4 = arith.constant 0 : index
    %c0_5 = arith.constant 0 : index
    %7 = vector.load %arg3[%c0_4, %c0_5] : memref<512x128xbf16, #tpu.memory_space<vmem>>, vector<512x128xbf16>
    %cst_6 = arith.constant dense<0.000000e+00> : vector<128x128xf32>
    %8 = tpu.matmul %6, %7, %cst_6 {dimension_numbers = #tpu.dot_dimension_numbers<[1], [0], [0], [1], [0, 0, 1, 1], [], []>} : vector<128x512xbf16>, vector<512x128xbf16>, vector<128x128xf32> -> vector<128x128xf32>
    %c0_7 = arith.constant 0 : index
    %c0_8 = arith.constant 0 : index
    %9 = vector.load %arg4[%c0_7, %c0_8] : memref<128x128xf32, #tpu.memory_space<vmem>>, vector<128x128xf32>
    tpu.vector_store %arg4[%c0_7, %c0_8], %8 {strides = array<i32>} : memref<128x128xf32, #tpu.memory_space<vmem>>, vector<128x128xf32>,
    return
  }
  func.func @transform_0(%arg0: i32) -> (i32, i32) {
    %c0_i32 = arith.constant 0 : i32
    %c0_i32_0 = arith.constant 0 : i32
    return %arg0, %c0_i32 : i32, i32
  }
  func.func @transform_1(%arg0: i32) -> (i32, i32) {
    %c0_i32 = arith.constant 0 : i32
    %c0_i32_0 = arith.constant 0 : i32
    %c0_i32_1 = arith.constant 0 : i32
    return %c0_i32, %c0_i32_0 : i32, i32
  }
  func.func @transform_2(%arg0: i32) -> (i32, i32) {
    %c0_i32 = arith.constant 0 : i32
    %c0_i32_0 = arith.constant 0 : i32
    %c0_i32_1 = arith.constant 0 : i32
    return %c0_i32, %c0_i32_0 : i32, i32
  }
  func.func @transform_3(%arg0: i32) -> (i32, i32) {
    %c0_i32 = arith.constant 0 : i32
    %c0_i32_0 = arith.constant 0 : i32
    return %arg0, %c0_i32 : i32, i32
  }
}

</mosaic_0001>

<bundles_post_ra>
// kernel: _ffn_resident.1
= control target key start
LH: loop header
LB: loop body
LE: loop exit
PB: predicated region body
PF: predicated region fallthrough
CT: control target
= control target key end

     0   :  { %v1336_v2 = vmov 0   ;;  %s1628_s0 = inlined_call_operand.vmem [shape: f32[128,128], index: 0, kind: input, shape index: {}]   ;;  %s1629_s1 = inlined_call_operand.vmem [shape: bf16[128,512], index: 1, kind: input, shape index: {}]   ;;  %s1630_s2 = inlined_call_operand.vmem [shape: bf16[512,128], index: 2, kind: input, shape index: {}]   ;;  %s1631_s3 = inlined_call_operand.hbm [shape: f32[128,128], index: 3, kind: output, shape index: {}]  }
   0x1   :  { %v1232_v0 = vld [vmem:[%s1629_s1 + $0x4] ss:$16 sps:$4 sm:$0xff]   ;;  %v1234_v1 = vld [vmem:[%s1629_s1 + $0xc] ss:$16 sps:$4 sm:$0xff]   ;;  %264 = vmatprep.mubr.bf16.mxu0 %v1336_v2  ;;  %377 = vmatprep.mubr.bf16.mxu1 %v1336_v2  ;;  %v1236_v3 = vld [vmem:[%s1629_s1] ss:$16 sps:$4 sm:$0xff]  }
   0x2   :  { %232 = vmatprep.subr.bf16.mxu0 %v1232_v0  ;;  %v1237_v4 = vld [vmem:[%s1629_s1 + $0x8] ss:$16 sps:$4 sm:$0xff]   ;;  %345 = vmatprep.subr.bf16.mxu1 %v1234_v1  ;;  %v1238_v5 = vld [vmem:[%s1629_s1 + $0x24] ss:$16 sps:$4 sm:$0xff]   ;;  %v1240_v6 = vld [vmem:[%s1629_s1 + $0x2c] ss:$16 sps:$4 sm:$0xff]  }
   0x3   :  { %233 = vmatpush1.bf16.msra.mxu0 %v1236_v3  ;;  %346 = vmatpush1.bf16.msra.mxu1 %v1237_v4  ;;  %v1242_v7 = vld [vmem:[%s1629_s1 + $0x20] ss:$16 sps:$4 sm:$0xff]   ;;  %v1243_v8 = vld [vmem:[%s1629_s1 + $0x28] ss:$16 sps:$4 sm:$0xff]   ;;  %v1244_v9 = vld [vmem:[%s1629_s1 + $0x44] ss:$16 sps:$4 sm:$0xff]  }
   0x4   :  { %234 = vmatprep.subr.bf16.mxu0 %v1238_v5  ;;  %347 = vmatprep.subr.bf16.mxu1 %v1240_v6  ;;  %v1246_v10 = vld [vmem:[%s1629_s1 + $0x4c] ss:$16 sps:$4 sm:$0xff]   ;;  %v1248_v11 = vld [vmem:[%s1629_s1 + $0x40] ss:$16 sps:$4 sm:$0xff]   ;;  %v1249_v12 = vld [vmem:[%s1629_s1 + $0x48] ss:$16 sps:$4 sm:$0xff]  }
   0x5   :  { %v1250_v13 = vld [vmem:[%s1629_s1 + $0x64] ss:$16 sps:$4 sm:$0xff]   ;;  %v1252_v14 = vld [vmem:[%s1629_s1 + $0x6c] ss:$16 sps:$4 sm:$0xff]   ;;  %v1254_v15 = vld [vmem:[%s1629_s1 + $0x60] ss:$16 sps:$4 sm:$0xff]  }
   0x6   :  { %v1255_v16 = vld [vmem:[%s1629_s1 + $0x68] ss:$16 sps:$4 sm:$0xff]   ;;  %v1256_v17 = vld [vmem:[%s1629_s1 + $0x84] ss:$16 sps:$4 sm:$0xff]   ;;  %v1258_v18 = vld [vmem:[%s1629_s1 + $0x8c] ss:$16 sps:$4 sm:$0xff]  }
   0x7   :  { %235 = vmatpush1.bf16.msra.mxu0 %v1242_v7  ;;  %348 = vmatpush1.bf16.msra.mxu1 %v1243_v8  ;;  %v1260_v19 = vld [vmem:[%s1629_s1 + $0x80] ss:$16 sps:$4 sm:$0xff]   ;;  %v1261_v20 = vld [vmem:[%s1629_s1 + $0x88] ss:$16 sps:$4 sm:$0xff]   ;;  %v1262_v21 = vld [vmem:[%s1629_s1 + $0xa4] ss:$16 sps:$4 sm:$0xff]  }
   0x8   :  { %236 = vmatprep.subr.bf16.mxu0 %v1244_v9  ;;  %349 = vmatprep.subr.bf16.mxu1 %v1246_v10  ;;  %v1264_v22 = vld [vmem:[%s1629_s1 + $0xac] ss:$16 sps:$4 sm:$0xff]   ;;  %v1266_v23 = vld [vmem:[%s1629_s1 + $0xa0] ss:$16 sps:$4 sm:$0xff]   ;;  %v1267_v24 = vld [vmem:[%s1629_s1 + $0xa8] ss:$16 sps:$4 sm:$0xff]  }
   0x9   :  { %v1268_v25 = vld [vmem:[%s1629_s1 + $0xc4] ss:$16 sps:$4 sm:$0xff]   ;;  %v1270_v26 = vld [vmem:[%s1629_s1 + $0xcc] ss:$16 sps:$4 sm:$0xff]   ;;  %v1272_v27 = vld [vmem:[%s1629_s1 + $0xc0] ss:$16 sps:$4 sm:$0xff]  }
   0xa   :  { %v1273_v28 = vld [vmem:[%s1629_s1 + $0xc8] ss:$16 sps:$4 sm:$0xff]   ;;  %v1274_v29 = vld [vmem:[%s1629_s1 + $0xe4] ss:$16 sps:$4 sm:$0xff]   ;;  %v1276_v30 = vld [vmem:[%s1629_s1 + $0xec] ss:$16 sps:$4 sm:$0xff]  }
   0xb   :  { %237 = vmatpush1.bf16.msra.mxu0 %v1248_v11  ;;  %350 = vmatpush1.bf16.msra.mxu1 %v1249_v12  ;;  %v1278_v31 = vld [vmem:[%s1629_s1 + $0xe0] ss:$16 sps:$4 sm:$0xff]   ;;  %v1279_v32 = vld [vmem:[%s1629_s1 + $0xe8] ss:$16 sps:$4 sm:$0xff]  }
   0xc   :  { %238 = vmatprep.subr.bf16.mxu0 %v1250_v13  ;;  %351 = vmatprep.subr.bf16.mxu1 %v1252_v14  ;;  %v16_v33 = vld [vmem:[%s1628_s0] sm:$0xff]  ;;  %v17_v34 = vld [vmem:[%s1628_s0 + $0x8] sm:$0xff]  ;;  %v18_v41 = vld [vmem:[%s1628_s0 + $0x10] sm:$0xff] }
   0xd   :  { %v1280_v35 = vld [vmem:[%s1630_s2 + $0x40] sm:$0xff]   ;;  %v32_v37 = vpack.c.bf16 %v17_v34, %v16_v33  ;;  %v1284_v40 = vld [vmem:[%s1630_s2 + $0x48] sm:$0xff]   ;;  %v19_v42 = vld [vmem:[%s1628_s0 + $0x18] sm:$0xff] }
   0xe   :  { %v1281_v36 = vld [vmem:[%s1630_s2 + $0xc0] sm:$0xff]   ;;  %v1285_v43 = vld [vmem:[%s1630_s2 + $0xc8] sm:$0xff]   ;;  %v1288_v46 = vld [vmem:[%s1630_s2 + $0x50] sm:$0xff]   ;;  %v33_v48 = vpack.c.bf16 %v19_v42, %v18_v41 }
   0xf   :  { %239 = vmatpush1.bf16.msra.mxu0 %v1254_v15  ;;  %352 = vmatpush1.bf16.msra.mxu1 %v1255_v16  ;;  %v1282_v38 = vld [vmem:[%s1630_s2] sm:$0xff]   ;;  %v1286_v44 = vld [vmem:[%s1630_s2 + $0x8] sm:$0xff]   ;;  %v1289_v47 = vld [vmem:[%s1630_s2 + $0xd0] sm:$0xff]  }
  0x10   :  { %240 = vmatprep.subr.bf16.mxu0 %v1256_v17  ;;  %353 = vmatprep.subr.bf16.mxu1 %v1258_v18  ;;  %v1283_v39 = vld [vmem:[%s1630_s2 + $0x80] sm:$0xff]   ;;  %v1287_v45 = vld [vmem:[%s1630_s2 + $0x88] sm:$0xff]   ;;  %v1290_v49 = vld [vmem:[%s1630_s2 + $0x10] sm:$0xff]  }
  0x11   :  { %v1291_v50 = vld [vmem:[%s1630_s2 + $0x90] sm:$0xff]   ;;  %v1292_v51 = vld [vmem:[%s1630_s2 + $0x58] sm:$0xff]   ;;  %v20_v52 = vld [vmem:[%s1628_s0 + $0x20] sm:$0xff] }
  0x12   :  { %v21_v53 = vld [vmem:[%s1628_s0 + $0x28] sm:$0xff]  ;;  %v1293_v54 = vld [vmem:[%s1630_s2 + $0xd8] sm:$0xff]   ;;  %v1296_v57 = vld [vmem:[%s1630_s2 + $0x60] sm:$0xff]  }
  0x13   :  { %241 = vmatpush1.bf16.msra.mxu0 %v1260_v19  ;;  %354 = vmatpush1.bf16.msra.mxu1 %v1261_v20  ;;  %v1294_v55 = vld [vmem:[%s1630_s2 + $0x18] sm:$0xff]   ;;  %v1297_v58 = vld [vmem:[%s1630_s2 + $0xe0] sm:$0xff]   ;;  %v34_v59 = vpack.c.bf16 %v21_v53, %v20_v52  ;;  %v1300_v62 = vld [vmem:[%s1630_s2 + $0x68] sm:$0xff]  }
  0x14   :  { %242 = vmatprep.subr.bf16.mxu0 %v1262_v21  ;;  %355 = vmatprep.subr.bf16.mxu1 %v1264_v22  ;;  %v1295_v56 = vld [vmem:[%s1630_s2 + $0x98] sm:$0xff]   ;;  %v1298_v60 = vld [vmem:[%s1630_s2 + $0x20] sm:$0xff]   ;;  %v22_v63 = vld [vmem:[%s1628_s0 + $0x30] sm:$0xff] }
  0x15   :  { %v1299_v61 = vld [vmem:[%s1630_s2 + $0xa0] sm:$0xff]   ;;  %v23_v0 = vld [vmem:[%s1628_s0 + $0x38] sm:$0xff]  ;;  %v1301_v1 = vld [vmem:[%s1630_s2 + $0xe8] sm:$0xff]  }
  0x16   :  { %v1302_v3 = vld [vmem:[%s1630_s2 + $0x28] sm:$0xff]   ;;  %v1304_v5 = vld [vmem:[%s1630_s2 + $0x70] sm:$0xff]   ;;  %v35_v7 = vpack.c.bf16 %v23_v0, %v22_v63 }
  0x17   :  { %243 = vmatpush1.bf16.msra.mxu0 %v1266_v23  ;;  %356 = vmatpush1.bf16.msra.mxu1 %v1267_v24  ;;  %v1303_v4 = vld [vmem:[%s1630_s2 + $0xa8] sm:$0xff]   ;;  %v1305_v6 = vld [vmem:[%s1630_s2 + $0xf0] sm:$0xff]  }
  0x18   :  { %244 = vmatprep.subr.bf16.mxu0 %v1268_v25  ;;  %357 = vmatprep.subr.bf16.mxu1 %v1270_v26  ;;  %v1306_v8 = vld [vmem:[%s1630_s2 + $0x30] sm:$0xff]  }
  0x19   :  { %v1307_v9 = vld [vmem:[%s1630_s2 + $0xb0] sm:$0xff]  }
  0x1b   :  { %245 = vmatpush1.bf16.msra.mxu0 %v1272_v27  ;;  %358 = vmatpush1.bf16.msra.mxu1 %v1273_v28 }
  0x1c   :  { %246 = vmatprep.subr.bf16.mxu0 %v1274_v29  ;;  %359 = vmatprep.subr.bf16.mxu1 %v1276_v30 }
  0x1f   :  { %247 = vmatpush1.bf16.msra.mxu0 %v1278_v31  ;;  %360 = vmatpush1.bf16.msra.mxu1 %v1279_v32 }
  0x20   :  { %1100 = vmatprep.subr.bf16.mxu0 %v1280_v35  ;;  %1164 = vmatprep.subr.bf16.mxu1 %v1281_v36 }
  0x22   :  { %265 = vmatmul.mubr.bf16.vlgmr.msra.gmra.mrb[0].mxu0 %v32_v37  ;;  %378 = vmatmul.mubr.bf16.vlgmr.msra.gmra.mrb[0].mxu1 %v32_v37 }
  0x23   :  { %274 = vmatprep.mubr.bf16.mxu0 %v1336_v2  ;;  %387 = vmatprep.mubr.bf16.mxu1 %v1336_v2 }
  0x24   :  { %1101 = vmatpush3.bf16.msra.mxu0 %v1282_v38  ;;  %1165 = vmatpush3.bf16.msra.mxu1 %v1283_v39 }
  0x25   :  { %1102 = vmatprep.subr.bf16.mxu0 %v1284_v40  ;;  %1166 = vmatprep.subr.bf16.mxu1 %v1285_v43 }
  0x28   :  { %1103 = vmatpush3.bf16.msra.mxu0 %v1286_v44  ;;  %1167 = vmatpush3.bf16.msra.mxu1 %v1287_v45 }
  0x29   :  { %1104 = vmatprep.subr.bf16.mxu0 %v1288_v46  ;;  %1168 = vmatprep.subr.bf16.mxu1 %v1289_v47 }
  0x2a   :  { %275 = vmatmul.mubr.bf16.gmra.mrb[4].mxu0 %v33_v48  ;;  %388 = vmatmul.mubr.bf16.gmra.mrb[4].mxu1 %v33_v48 }
  0x2b   :  { %284 = vmatprep.mubr.bf16.mxu0 %v1336_v2  ;;  %397 = vmatprep.mubr.bf16.mxu1 %v1336_v2 }
  0x2c   :  { %1105 = vmatpush3.bf16.msra.mxu0 %v1290_v49  ;;  %1169 = vmatpush3.bf16.msra.mxu1 %v1291_v50 }
  0x2d   :  { %1106 = vmatprep.subr.bf16.mxu0 %v1292_v51  ;;  %1170 = vmatprep.subr.bf16.mxu1 %v1293_v54 }
  0x30   :  { %1107 = vmatpush3.bf16.msra.mxu0 %v1294_v55  ;;  %1171 = vmatpush3.bf16.msra.mxu1 %v1295_v56 }
  0x31   :  { %1108 = vmatprep.subr.bf16.mxu0 %v1296_v57  ;;  %1172 = vmatprep.subr.bf16.mxu1 %v1297_v58 }
  0x32   :  { %285 = vmatmul.mubr.bf16.gmra.mrb[8].mxu0 %v34_v59  ;;  %398 = vmatmul.mubr.bf16.gmra.mrb[8].mxu1 %v34_v59 }
  0x33   :  { %294 = vmatprep.mubr.bf16.mxu0 %v1336_v2  ;;  %407 = vmatprep.mubr.bf16.mxu1 %v1336_v2 }
  0x34   :  { %1109 = vmatpush3.bf16.msra.mxu0 %v1298_v60  ;;  %1173 = vmatpush3.bf16.msra.mxu1 %v1299_v61 }
  0x35   :  { %1110 = vmatprep.subr.bf16.mxu0 %v1300_v62  ;;  %1174 = vmatprep.subr.bf16.mxu1 %v1301_v1 }
  0x38   :  { %1111 = vmatpush3.bf16.msra.mxu0 %v1302_v3  ;;  %1175 = vmatpush3.bf16.msra.mxu1 %v1303_v4 }
  0x39   :  { %8 = vsyncpa [#allocation3], 0  ;;  %1112 = vmatprep.subr.bf16.mxu0 %v1304_v5  ;;  %1176 = vmatprep.subr.bf16.mxu1 %v1305_v6  ;;  %v24_v10 = vld [vmem:[%s1628_s0 + $0x40] sm:$0xff]  ;;  %v25_v11 = vld [vmem:[%s1628_s0 + $0x48] sm:$0xff] }
  0x3a   :  { %295 = vmatmul.mubr.bf16.gmra.mrb[12].mxu0 %v35_v7  ;;  %408 = vmatmul.mubr.bf16.gmra.mrb[12].mxu1 %v35_v7  ;;  %v36_v12 = vpack.c.bf16 %v25_v11, %v24_v10  ;;  %v26_v13 = vld [vmem:[%s1628_s0 + $0x50] sm:$0xff]  ;;  %v27_v14 = vld [vmem:[%s1628_s0 + $0x58] sm:$0xff]  ;;  %v28_v16 = vld [vmem:[%s1628_s0 + $0x60] sm:$0xff] }
  0x3b   :  { %304 = vmatprep.mubr.bf16.mxu0 %v1336_v2  ;;  %417 = vmatprep.mubr.bf16.mxu1 %v1336_v2  ;;  %v37_v15 = vpack.c.bf16 %v27_v14, %v26_v13  ;;  %v29_v17 = vld [vmem:[%s1628_s0 + $0x68] sm:$0xff]  ;;  %v30_v19 = vld [vmem:[%s1628_s0 + $0x70] sm:$0xff]  ;;  %v31_v20 = vld [vmem:[%s1628_s0 + $0x78] sm:$0xff]  ;;  %s1337_s0 = smov [#allocation2]  }
  0x3c   :  { %1113 = vmatpush3.bf16.msra.mxu0 %v1306_v8  ;;  %1177 = vmatpush3.bf16.msra.mxu1 %v1307_v9  ;;  %v38_v18 = vpack.c.bf16 %v29_v17, %v28_v16  ;;  %v39_v21 = vpack.c.bf16 %v31_v20, %v30_v19  ;;  %v1308_v22 = vld [vmem:[%s1630_s2 + $0x78] sm:$0xff]  }
  0x3d   :  { %v1309_v23 = vld [vmem:[%s1630_s2 + $0xf8] sm:$0xff]   ;;  %1114 = vmatprep.subr.bf16.mxu0 %v1308_v22 }
  0x3e   :  { %v1311_v24 = vld [vmem:[%s1630_s2 + $0xb8] sm:$0xff]   ;;  %1178 = vmatprep.subr.bf16.mxu1 %v1309_v23 }
  0x40   :  { %1179 = vmatpush3.bf16.msra.mxu1 %v1311_v24 }
  0x42   :  { %305 = vmatmul.mubr.bf16.gmra.mrb[16].mxu0 %v36_v12  ;;  %418 = vmatmul.mubr.bf16.gmra.mrb[16].mxu1 %v36_v12 }
  0x43   :  { %314 = vmatprep.mubr.bf16.mxu0 %v1336_v2  ;;  %427 = vmatprep.mubr.bf16.mxu1 %v1336_v2 }
  0x4a   :  { %315 = vmatmul.mubr.bf16.gmra.mrb[20].mxu0 %v37_v15  ;;  %428 = vmatmul.mubr.bf16.gmra.mrb[20].mxu1 %v37_v15 }
  0x4b   :  { %324 = vmatprep.mubr.bf16.mxu0 %v1336_v2  ;;  %437 = vmatprep.mubr.bf16.mxu1 %v1336_v2 }
  0x52   :  { %325 = vmatmul.mubr.bf16.gmra.mrb[24].mxu0 %v38_v18  ;;  %438 = vmatmul.mubr.bf16.gmra.mrb[24].mxu1 %v38_v18 }
  0x53   :  { %334 = vmatprep.mubr.bf16.mxu0 %v1336_v2  ;;  %447 = vmatprep.mubr.bf16.mxu1 %v1336_v2  ;;  %v1310_v2 = vld [vmem:[%s1630_s2 + $0x38] sm:$0xff]   ;;  %s1025_s2 = sshll.u32 %s1337_s0, 4  ;;  %s1026_s2 = int_to_ptr.vmem [resolvable:$true] %s1025_s2 }
  0x54   :  { %1115 = vmatpush3.bf16.msra.mxu0 %v1310_v2  ;;  %s1312_s6 = scalar_lea.vmem %s1026_s2, 2048  ;;  %p1317_p1 = scmp.lt.s32.totalorder %s1026_s2, %s1026_s2 }
  0x55   :  { %p1313_p0 = scmp.ne.s32.totalorder %s1026_s2, %s1312_s6  ;;  %p1318_p2 = scmp.lt.s32.totalorder %s1312_s6, %s1312_s6 }
  0x57   :  { %p1319_p3 = por %p1318_p2, %p1317_p1 }
  0x59   :  { %p1320_p4 = pnand %p1319_p3, %p1313_p0 }
  0x5a   :  { %335 = vmatmul.mubr.bf16.gmra.mrb[28].mxu0 %v39_v21  ;;  %448 = vmatmul.mubr.bf16.gmra.mrb[28].mxu1 %v39_v21 }
  0xf5   :  { %v266_v25 = vpop.f32.mrb[0].mxu0  ;;  %v379_v26 = vpop.f32.mrb[0].mxu1 }
  0xf6   :  { %v268_v27 = vpop.f32.mrb[1].mxu0  ;;  %v381_v28 = vpop.f32.mrb[1].mxu1  ;;  %v458_v31 = vmax.f32 %v266_v25, 0.0  ;;  %v460_v32 = vmax.f32 %v379_v26, 0.0 }
  0xf7   :  { %v270_v29 = vpop.f32.mrb[2].mxu0  ;;  %v383_v30 = vpop.f32.mrb[2].mxu1  ;;  %v459_v37 = vmax.f32 %v268_v27, 0.0  ;;  %v461_v38 = vmax.f32 %v381_v28, 0.0 }
  0xf8   :  { %v462_v33 = vmax.f32 %v270_v29, 0.0  ;;  %v464_v34 = vmax.f32 %v383_v30, 0.0  ;;  %v272_v35 = vpop.f32.mrb[3].mxu0  ;;  %v385_v36 = vpop.f32.mrb[3].mxu1 }
  0xf9   :  { %v463_v39 = vmax.f32 %v272_v35, 0.0  ;;  %v465_v40 = vmax.f32 %v385_v36, 0.0 }
  0xfa   :  { %v522_v41 = vpack.c.bf16 %v462_v33, %v458_v31  ;;  %v524_v42 = vpack.c.bf16 %v464_v34, %v460_v32 }
  0xfb   :  { %v523_v43 = vpack.c.bf16 %v463_v39, %v459_v37  ;;  %v525_v44 = vpack.c.bf16 %v465_v40, %v461_v38 }
  0xfd   :  { %v276_v45 = vpop.f32.mrb[4].mxu0  ;;  %v389_v46 = vpop.f32.mrb[4].mxu1  ;;  %842 = vmatprep.mubr.bf16.mxu0 %v523_v43  ;;  %939 = vmatprep.mubr.bf16.mxu1 %v525_v44 }
  0xfe   :  { %v278_v47 = vpop.f32.mrb[5].mxu0  ;;  %v391_v48 = vpop.f32.mrb[5].mxu1  ;;  %843 = vmatmul.mubr.bf16.vlgmr.msra.gmra.mrb[32].mxu0 %v522_v41  ;;  %940 = vmatmul.mubr.bf16.vlgmr.msra.gmra.mrb[32].mxu1 %v524_v42  ;;  %v466_v51 = vmax.f32 %v276_v45, 0.0  ;;  %v468_v52 = vmax.f32 %v389_v46, 0.0 }
  0xff   :  { %v280_v49 = vpop.f32.mrb[6].mxu0  ;;  %v393_v50 = vpop.f32.mrb[6].mxu1  ;;  %v467_v57 = vmax.f32 %v278_v47, 0.0  ;;  %v469_v58 = vmax.f32 %v391_v48, 0.0 }
 0x100   :  { %v470_v53 = vmax.f32 %v280_v49, 0.0  ;;  %v472_v54 = vmax.f32 %v393_v50, 0.0  ;;  %v282_v55 = vpop.f32.mrb[7].mxu0  ;;  %v395_v56 = vpop.f32.mrb[7].mxu1 }
 0x101   :  { %v471_v59 = vmax.f32 %v282_v55, 0.0  ;;  %v473_v60 = vmax.f32 %v395_v56, 0.0 }
 0x102   :  { %v526_v61 = vpack.c.bf16 %v470_v53, %v466_v51  ;;  %v528_v62 = vpack.c.bf16 %v472_v54, %v468_v52 }
 0x103   :  { %v527_v63 = vpack.c.bf16 %v471_v59, %v467_v57  ;;  %v529_v0 = vpack.c.bf16 %v473_v60, %v469_v58 }
 0x105   :  { %v286_v1 = vpop.f32.mrb[8].mxu0  ;;  %v399_v3 = vpop.f32.mrb[8].mxu1  ;;  %850 = vmatprep.mubr.bf16.mxu0 %v527_v63  ;;  %947 = vmatprep.mubr.bf16.mxu1 %v529_v0 }
 0x106   :  { %v288_v4 = vpop.f32.mrb[9].mxu0  ;;  %v401_v5 = vpop.f32.mrb[9].mxu1  ;;  %851 = vmatmul.mubr.bf16.gmra.mrb[36].mxu0 %v526_v61  ;;  %948 = vmatmul.mubr.bf16.gmra.mrb[36].mxu1 %v528_v62  ;;  %v474_v8 = vmax.f32 %v286_v1, 0.0  ;;  %v476_v9 = vmax.f32 %v399_v3, 0.0 }
 0x107   :  { %v290_v6 = vpop.f32.mrb[10].mxu0  ;;  %v403_v7 = vpop.f32.mrb[10].mxu1  ;;  %v475_v14 = vmax.f32 %v288_v4, 0.0  ;;  %v477_v15 = vmax.f32 %v401_v5, 0.0 }
 0x108   :  { %v478_v10 = vmax.f32 %v290_v6, 0.0  ;;  %v480_v11 = vmax.f32 %v403_v7, 0.0  ;;  %v292_v12 = vpop.f32.mrb[11].mxu0  ;;  %v405_v13 = vpop.f32.mrb[11].mxu1 }
 0x109   :  { %v479_v16 = vmax.f32 %v292_v12, 0.0  ;;  %v481_v17 = vmax.f32 %v405_v13, 0.0 }
 0x10a   :  { %v530_v18 = vpack.c.bf16 %v478_v10, %v474_v8  ;;  %v532_v19 = vpack.c.bf16 %v480_v11, %v476_v9 }
 0x10b   :  { %v531_v20 = vpack.c.bf16 %v479_v16, %v475_v14  ;;  %v533_v21 = vpack.c.bf16 %v481_v17, %v477_v15 }
 0x10d   :  { %v296_v22 = vpop.f32.mrb[12].mxu0  ;;  %v409_v23 = vpop.f32.mrb[12].mxu1  ;;  %858 = vmatprep.mubr.bf16.mxu0 %v531_v20  ;;  %955 = vmatprep.mubr.bf16.mxu1 %v533_v21 }
 0x10e   :  { %v298_v2 = vpop.f32.mrb[13].mxu0  ;;  %v411_v24 = vpop.f32.mrb[13].mxu1  ;;  %859 = vmatmul.mubr.bf16.gmra.mrb[40].mxu0 %v530_v18  ;;  %956 = vmatmul.mubr.bf16.gmra.mrb[40].mxu1 %v532_v19  ;;  %v482_v27 = vmax.f32 %v296_v22, 0.0  ;;  %v484_v28 = vmax.f32 %v409_v23, 0.0 }
 0x10f   :  { %v300_v25 = vpop.f32.mrb[14].mxu0  ;;  %v413_v26 = vpop.f32.mrb[14].mxu1  ;;  %v483_v33 = vmax.f32 %v298_v2, 0.0  ;;  %v485_v34 = vmax.f32 %v411_v24, 0.0 }
 0x110   :  { %v486_v29 = vmax.f32 %v300_v25, 0.0  ;;  %v488_v30 = vmax.f32 %v413_v26, 0.0  ;;  %v302_v31 = vpop.f32.mrb[15].mxu0  ;;  %v415_v32 = vpop.f32.mrb[15].mxu1 }
 0x111   :  { %v487_v35 = vmax.f32 %v302_v31, 0.0  ;;  %v489_v36 = vmax.f32 %v415_v32, 0.0 }
 0x112   :  { %v534_v37 = vpack.c.bf16 %v486_v29, %v482_v27  ;;  %v536_v38 = vpack.c.bf16 %v488_v30, %v484_v28 }
 0x113   :  { %v535_v39 = vpack.c.bf16 %v487_v35, %v483_v33  ;;  %v537_v40 = vpack.c.bf16 %v489_v36, %v485_v34 }
 0x115   :  { %v306_v41 = vpop.f32.mrb[16].mxu0  ;;  %v419_v42 = vpop.f32.mrb[16].mxu1  ;;  %866 = vmatprep.mubr.bf16.mxu0 %v535_v39  ;;  %963 = vmatprep.mubr.bf16.mxu1 %v537_v40 }
 0x116   :  { %v308_v43 = vpop.f32.mrb[17].mxu0  ;;  %v421_v44 = vpop.f32.mrb[17].mxu1  ;;  %867 = vmatmul.mubr.bf16.gmra.mrb[44].mxu0 %v534_v37  ;;  %964 = vmatmul.mubr.bf16.gmra.mrb[44].mxu1 %v536_v38  ;;  %v490_v47 = vmax.f32 %v306_v41, 0.0  ;;  %v492_v48 = vmax.f32 %v419_v42, 0.0 }
 0x117   :  { %v310_v45 = vpop.f32.mrb[18].mxu0  ;;  %v423_v46 = vpop.f32.mrb[18].mxu1  ;;  %v491_v53 = vmax.f32 %v308_v43, 0.0  ;;  %v493_v54 = vmax.f32 %v421_v44, 0.0 }
 0x118   :  { %v494_v49 = vmax.f32 %v310_v45, 0.0  ;;  %v496_v50 = vmax.f32 %v423_v46, 0.0  ;;  %v312_v51 = vpop.f32.mrb[19].mxu0  ;;  %v425_v52 = vpop.f32.mrb[19].mxu1 }
 0x119   :  { %v495_v55 = vmax.f32 %v312_v51, 0.0  ;;  %v497_v56 = vmax.f32 %v425_v52, 0.0 }
 0x11a   :  { %v538_v57 = vpack.c.bf16 %v494_v49, %v490_v47  ;;  %v540_v58 = vpack.c.bf16 %v496_v50, %v492_v48 }
 0x11b   :  { %v539_v59 = vpack.c.bf16 %v495_v55, %v491_v53  ;;  %v541_v60 = vpack.c.bf16 %v497_v56, %v493_v54 }
 0x11d   :  { %v316_v61 = vpop.f32.mrb[20].mxu0  ;;  %v429_v62 = vpop.f32.mrb[20].mxu1  ;;  %874 = vmatprep.mubr.bf16.mxu0 %v539_v59  ;;  %971 = vmatprep.mubr.bf16.mxu1 %v541_v60 }
 0x11e   :  { %v318_v63 = vpop.f32.mrb[21].mxu0  ;;  %v431_v0 = vpop.f32.mrb[21].mxu1  ;;  %875 = vmatmul.mubr.bf16.gmra.mrb[48].mxu0 %v538_v57  ;;  %972 = vmatmul.mubr.bf16.gmra.mrb[48].mxu1 %v540_v58  ;;  %v498_v4 = vmax.f32 %v316_v61, 0.0  ;;  %v500_v5 = vmax.f32 %v429_v62, 0.0 }
 0x11f   :  { %v320_v1 = vpop.f32.mrb[22].mxu0  ;;  %v433_v3 = vpop.f32.mrb[22].mxu1  ;;  %v499_v10 = vmax.f32 %v318_v63, 0.0  ;;  %v501_v11 = vmax.f32 %v431_v0, 0.0 }
 0x120   :  { %v502_v6 = vmax.f32 %v320_v1, 0.0  ;;  %v504_v7 = vmax.f32 %v433_v3, 0.0  ;;  %v322_v8 = vpop.f32.mrb[23].mxu0  ;;  %v435_v9 = vpop.f32.mrb[23].mxu1 }
 0x121   :  { %v503_v12 = vmax.f32 %v322_v8, 0.0  ;;  %v505_v13 = vmax.f32 %v435_v9, 0.0 }
 0x122   :  { %v542_v14 = vpack.c.bf16 %v502_v6, %v498_v4  ;;  %v544_v15 = vpack.c.bf16 %v504_v7, %v500_v5 }
 0x123   :  { %v543_v16 = vpack.c.bf16 %v503_v12, %v499_v10  ;;  %v545_v17 = vpack.c.bf16 %v505_v13, %v501_v11 }
 0x125   :  { %v326_v18 = vpop.f32.mrb[24].mxu0  ;;  %v439_v19 = vpop.f32.mrb[24].mxu1  ;;  %882 = vmatprep.mubr.bf16.mxu0 %v543_v16  ;;  %979 = vmatprep.mubr.bf16.mxu1 %v545_v17 }
 0x126   :  { %v328_v20 = vpop.f32.mrb[25].mxu0  ;;  %v441_v21 = vpop.f32.mrb[25].mxu1  ;;  %883 = vmatmul.mubr.bf16.gmra.mrb[52].mxu0 %v542_v14  ;;  %980 = vmatmul.mubr.bf16.gmra.mrb[52].mxu1 %v544_v15  ;;  %v506_v2 = vmax.f32 %v326_v18, 0.0  ;;  %v508_v24 = vmax.f32 %v439_v19, 0.0 }
 0x127   :  { %v330_v22 = vpop.f32.mrb[26].mxu0  ;;  %v443_v23 = vpop.f32.mrb[26].mxu1  ;;  %v507_v29 = vmax.f32 %v328_v20, 0.0  ;;  %v509_v30 = vmax.f32 %v441_v21, 0.0 }
 0x128   :  { %v510_v25 = vmax.f32 %v330_v22, 0.0  ;;  %v512_v26 = vmax.f32 %v443_v23, 0.0  ;;  %v332_v27 = vpop.f32.mrb[27].mxu0  ;;  %v445_v28 = vpop.f32.mrb[27].mxu1 }
 0x129   :  { %v511_v31 = vmax.f32 %v332_v27, 0.0  ;;  %v513_v32 = vmax.f32 %v445_v28, 0.0 }
 0x12a   :  { %v546_v33 = vpack.c.bf16 %v510_v25, %v506_v2  ;;  %v548_v34 = vpack.c.bf16 %v512_v26, %v508_v24 }
 0x12b   :  { %v547_v35 = vpack.c.bf16 %v511_v31, %v507_v29  ;;  %v549_v36 = vpack.c.bf16 %v513_v32, %v509_v30 }
 0x12d   :  { %v336_v37 = vpop.f32.mrb[28].mxu0  ;;  %v449_v38 = vpop.f32.mrb[28].mxu1  ;;  %890 = vmatprep.mubr.bf16.mxu0 %v547_v35  ;;  %987 = vmatprep.mubr.bf16.mxu1 %v549_v36 }
 0x12e   :  { %v338_v39 = vpop.f32.mrb[29].mxu0  ;;  %v451_v40 = vpop.f32.mrb[29].mxu1  ;;  %891 = vmatmul.mubr.bf16.gmra.mrb[56].mxu0 %v546_v33  ;;  %988 = vmatmul.mubr.bf16.gmra.mrb[56].mxu1 %v548_v34  ;;  %v514_v43 = vmax.f32 %v336_v37, 0.0  ;;  %v516_v44 = vmax.f32 %v449_v38, 0.0 }
 0x12f   :  { %v340_v41 = vpop.f32.mrb[30].mxu0  ;;  %v453_v42 = vpop.f32.mrb[30].mxu1  ;;  %v515_v49 = vmax.f32 %v338_v39, 0.0  ;;  %v517_v50 = vmax.f32 %v451_v40, 0.0 }
 0x130   :  { %v518_v45 = vmax.f32 %v340_v41, 0.0  ;;  %v520_v46 = vmax.f32 %v453_v42, 0.0  ;;  %v342_v47 = vpop.f32.mrb[31].mxu0  ;;  %v455_v48 = vpop.f32.mrb[31].mxu1 }
 0x131   :  { %v519_v51 = vmax.f32 %v342_v47, 0.0  ;;  %v521_v52 = vmax.f32 %v455_v48, 0.0 }
 0x132   :  { %v550_v53 = vpack.c.bf16 %v518_v45, %v514_v43  ;;  %v552_v54 = vpack.c.bf16 %v520_v46, %v516_v44 }
 0x133   :  { %v551_v55 = vpack.c.bf16 %v519_v51, %v515_v49  ;;  %v553_v56 = vpack.c.bf16 %v521_v52, %v517_v50 }
 0x135   :  { %898 = vmatprep.mubr.bf16.mxu0 %v551_v55  ;;  %995 = vmatprep.mubr.bf16.mxu1 %v553_v56 }
 0x136   :  { %899 = vmatmul.mubr.bf16.gmra.mrb[60].mxu0 %v550_v53  ;;  %996 = vmatmul.mubr.bf16.gmra.mrb[60].mxu1 %v552_v54 }
 0x1d1   :  { %v1116_v57 = vpop.f32.mrb[32].mxu0  ;;  %v1180_v58 = vpop.f32.mrb[32].mxu1 }
 0x1d2   :  { %v1117_v59 = vpop.f32.mrb[33].mxu0  ;;  %v1181_v60 = vpop.f32.mrb[33].mxu1 }
 0x1d3   :  { %v1118_v61 = vadd.f32 %v1117_v59, %v1116_v57  ;;  %v1182_v62 = vadd.f32 %v1181_v60, %v1180_v58  ;;  %v1119_v63 = vpop.f32.mrb[34].mxu0  ;;  %v1183_v0 = vpop.f32.mrb[34].mxu1 }
 0x1d4   :  { %v1120_v1 = vpop.f32.mrb[35].mxu0  ;;  %v1184_v3 = vpop.f32.mrb[35].mxu1 }
 0x1d5   :  { %v942_v4 = vadd.f32 %v1182_v62, %v1118_v61  ;;  %v1121_v5 = vadd.f32 %v1120_v1, %v1119_v63  ;;  %v1185_v6 = vadd.f32 %v1184_v3, %v1183_v0 }
 0x1d7   :  { %1004 = vst [vmem:[#allocation2] sm:$0xff] %v942_v4  ;;  %v945_v7 = vadd.f32 %v1185_v6, %v1121_v5 }
 0x1d9   :  { %1005 = vst [vmem:[#allocation2 + $0x8] sm:$0xff] %v945_v7  ;;  %v1122_v8 = vpop.f32.mrb[36].mxu0  ;;  %v1186_v9 = vpop.f32.mrb[36].mxu1 }
 0x1da   :  { %v1123_v10 = vpop.f32.mrb[37].mxu0  ;;  %v1187_v11 = vpop.f32.mrb[37].mxu1 }
 0x1db   :  { %v1124_v12 = vadd.f32 %v1123_v10, %v1122_v8  ;;  %v1188_v13 = vadd.f32 %v1187_v11, %v1186_v9  ;;  %v1125_v14 = vpop.f32.mrb[38].mxu0  ;;  %v1189_v15 = vpop.f32.mrb[38].mxu1 }
 0x1dc   :  { %v1126_v16 = vpop.f32.mrb[39].mxu0  ;;  %v1190_v17 = vpop.f32.mrb[39].mxu1 }
 0x1dd   :  { %v950_v18 = vadd.f32 %v1188_v13, %v1124_v12  ;;  %v1127_v19 = vadd.f32 %v1126_v16, %v1125_v14  ;;  %v1191_v20 = vadd.f32 %v1190_v17, %v1189_v15 }
 0x1df   :  { %1006 = vst [vmem:[#allocation2 + $0x10] sm:$0xff] %v950_v18  ;;  %v953_v21 = vadd.f32 %v1191_v20, %v1127_v19 }
 0x1e1   :  { %1007 = vst [vmem:[#allocation2 + $0x18] sm:$0xff] %v953_v21  ;;  %v1128_v22 = vpop.f32.mrb[40].mxu0  ;;  %v1192_v23 = vpop.f32.mrb[40].mxu1 }
 0x1e2   :  { %v1129_v2 = vpop.f32.mrb[41].mxu0  ;;  %v1193_v24 = vpop.f32.mrb[41].mxu1 }
 0x1e3   :  { %v1130_v25 = vadd.f32 %v1129_v2, %v1128_v22  ;;  %v1194_v26 = vadd.f32 %v1193_v24, %v1192_v23  ;;  %v1131_v27 = vpop.f32.mrb[42].mxu0  ;;  %v1195_v28 = vpop.f32.mrb[42].mxu1 }
 0x1e4   :  { %v1132_v29 = vpop.f32.mrb[43].mxu0  ;;  %v1196_v30 = vpop.f32.mrb[43].mxu1 }
 0x1e5   :  { %v958_v31 = vadd.f32 %v1194_v26, %v1130_v25  ;;  %v1133_v32 = vadd.f32 %v1132_v29, %v1131_v27  ;;  %v1197_v33 = vadd.f32 %v1196_v30, %v1195_v28 }
 0x1e7   :  { %1008 = vst [vmem:[#allocation2 + $0x20] sm:$0xff] %v958_v31  ;;  %v961_v34 = vadd.f32 %v1197_v33, %v1133_v32 }
 0x1e9   :  { %1009 = vst [vmem:[#allocation2 + $0x28] sm:$0xff] %v961_v34  ;;  %v1134_v35 = vpop.f32.mrb[44].mxu0  ;;  %v1198_v36 = vpop.f32.mrb[44].mxu1 }
 0x1ea   :  { %v1135_v37 = vpop.f32.mrb[45].mxu0  ;;  %v1199_v38 = vpop.f32.mrb[45].mxu1 }
 0x1eb   :  { %v1136_v39 = vadd.f32 %v1135_v37, %v1134_v35  ;;  %v1200_v40 = vadd.f32 %v1199_v38, %v1198_v36  ;;  %v1137_v41 = vpop.f32.mrb[46].mxu0  ;;  %v1201_v42 = vpop.f32.mrb[46].mxu1 }
 0x1ec   :  { %v1138_v43 = vpop.f32.mrb[47].mxu0  ;;  %v1202_v44 = vpop.f32.mrb[47].mxu1 }
 0x1ed   :  { %v966_v45 = vadd.f32 %v1200_v40, %v1136_v39  ;;  %v1139_v46 = vadd.f32 %v1138_v43, %v1137_v41  ;;  %v1203_v47 = vadd.f32 %v1202_v44, %v1201_v42 }
 0x1ef   :  { %1010 = vst [vmem:[#allocation2 + $0x30] sm:$0xff] %v966_v45  ;;  %v969_v48 = vadd.f32 %v1203_v47, %v1139_v46 }
 0x1f1   :  { %1011 = vst [vmem:[#allocation2 + $0x38] sm:$0xff] %v969_v48  ;;  %v1140_v49 = vpop.f32.mrb[48].mxu0  ;;  %v1204_v50 = vpop.f32.mrb[48].mxu1 }
 0x1f2   :  { %v1141_v51 = vpop.f32.mrb[49].mxu0  ;;  %v1205_v52 = vpop.f32.mrb[49].mxu1 }
 0x1f3   :  { %v1142_v53 = vadd.f32 %v1141_v51, %v1140_v49  ;;  %v1206_v54 = vadd.f32 %v1205_v52, %v1204_v50  ;;  %v1143_v55 = vpop.f32.mrb[50].mxu0  ;;  %v1207_v56 = vpop.f32.mrb[50].mxu1 }
 0x1f4   :  { %v1144_v57 = vpop.f32.mrb[51].mxu0  ;;  %v1208_v58 = vpop.f32.mrb[51].mxu1 }
 0x1f5   :  { %v974_v59 = vadd.f32 %v1206_v54, %v1142_v53  ;;  %v1145_v60 = vadd.f32 %v1144_v57, %v1143_v55  ;;  %v1209_v61 = vadd.f32 %v1208_v58, %v1207_v56 }
 0x1f7   :  { %1012 = vst [vmem:[#allocation2 + $0x40] sm:$0xff] %v974_v59  ;;  %v977_v62 = vadd.f32 %v1209_v61, %v1145_v60 }
 0x1f9   :  { %1013 = vst [vmem:[#allocation2 + $0x48] sm:$0xff] %v977_v62  ;;  %v1146_v63 = vpop.f32.mrb[52].mxu0  ;;  %v1210_v0 = vpop.f32.mrb[52].mxu1 }
 0x1fa   :  { %v1147_v1 = vpop.f32.mrb[53].mxu0  ;;  %v1211_v3 = vpop.f32.mrb[53].mxu1 }
 0x1fb   :  { %v1148_v4 = vadd.f32 %v1147_v1, %v1146_v63  ;;  %v1212_v5 = vadd.f32 %v1211_v3, %v1210_v0  ;;  %v1149_v6 = vpop.f32.mrb[54].mxu0  ;;  %v1213_v7 = vpop.f32.mrb[54].mxu1 }
 0x1fc   :  { %v1150_v8 = vpop.f32.mrb[55].mxu0  ;;  %v1214_v9 = vpop.f32.mrb[55].mxu1 }
 0x1fd   :  { %v982_v10 = vadd.f32 %v1212_v5, %v1148_v4  ;;  %v1151_v11 = vadd.f32 %v1150_v8, %v1149_v6  ;;  %v1215_v12 = vadd.f32 %v1214_v9, %v1213_v7 }
 0x1ff   :  { %1014 = vst [vmem:[#allocation2 + $0x50] sm:$0xff] %v982_v10  ;;  %v985_v13 = vadd.f32 %v1215_v12, %v1151_v11 }
 0x201   :  { %1015 = vst [vmem:[#allocation2 + $0x58] sm:$0xff] %v985_v13  ;;  %v1152_v14 = vpop.f32.mrb[56].mxu0  ;;  %v1216_v15 = vpop.f32.mrb[56].mxu1 }
 0x202   :  { %v1153_v16 = vpop.f32.mrb[57].mxu0  ;;  %v1217_v17 = vpop.f32.mrb[57].mxu1 }
 0x203   :  { %v1154_v18 = vadd.f32 %v1153_v16, %v1152_v14  ;;  %v1218_v19 = vadd.f32 %v1217_v17, %v1216_v15  ;;  %v1155_v20 = vpop.f32.mrb[58].mxu0  ;;  %v1219_v21 = vpop.f32.mrb[58].mxu1 }
 0x204   :  { %v1156_v22 = vpop.f32.mrb[59].mxu0  ;;  %v1220_v23 = vpop.f32.mrb[59].mxu1 }
 0x205   :  { %v990_v2 = vadd.f32 %v1218_v19, %v1154_v18  ;;  %v1157_v24 = vadd.f32 %v1156_v22, %v1155_v20  ;;  %v1221_v25 = vadd.f32 %v1220_v23, %v1219_v21 }
 0x207   :  { %1016 = vst [vmem:[#allocation2 + $0x60] sm:$0xff] %v990_v2  ;;  %v993_v26 = vadd.f32 %v1221_v25, %v1157_v24 }
 0x209   :  { %1017 = vst [vmem:[#allocation2 + $0x68] sm:$0xff] %v993_v26  ;;  %v1158_v27 = vpop.f32.mrb[60].mxu0  ;;  %v1222_v28 = vpop.f32.mrb[60].mxu1 }
 0x20a   :  { %v1159_v29 = vpop.f32.mrb[61].mxu0  ;;  %v1223_v30 = vpop.f32.mrb[61].mxu1 }
 0x20b   :  { %v1160_v31 = vadd.f32 %v1159_v29, %v1158_v27  ;;  %v1224_v32 = vadd.f32 %v1223_v30, %v1222_v28  ;;  %v1161_v33 = vpop.f32.mrb[62].mxu0  ;;  %v1225_v34 = vpop.f32.mrb[62].mxu1 }
 0x20c   :  { %v1162_v35 = vpop.f32.mrb[63].mxu0  ;;  %v1226_v36 = vpop.f32.mrb[63].mxu1 }
 0x20d   :  { %v998_v37 = vadd.f32 %v1224_v32, %v1160_v31  ;;  %v1163_v38 = vadd.f32 %v1162_v35, %v1161_v33  ;;  %v1227_v39 = vadd.f32 %v1226_v36, %v1225_v34 }
 0x20f   :  { %1018 = vst [vmem:[#allocation2 + $0x70] sm:$0xff] %v998_v37  ;;  %v1001_v40 = vadd.f32 %v1227_v39, %v1163_v38 }
 0x211   :  { %1019 = vst [vmem:[#allocation2 + $0x78] sm:$0xff] %v1001_v40 }
 0x212   :  { %1323 = shalt.err (!%p1320_p4)
}
 0x213   :  { %s1324_s9 = scalar_lea.hbm %s1631_s3, 2048 }
 0x214   :  { %p1325_p5 = scmp.ne.s32.totalorder %s1631_s3, %s1324_s9  ;;  %p1328_p6 = scmp.lt.u32.totalorder %s1324_s9, %s1631_s3 }
 0x216   :  { %p1330_p7 = pnand %p1328_p6, %p1325_p5 }
 0x218   :  { %1333 = shalt.err (!%p1330_p7)
}
 0x219   :  { %s1338_s14 = smov 128   ;;  %s1339_s15 = smov 8  }
 0x21a   :  { %1031 = dma.vmem_to_hbm [thread:$0]  %s1026_s2, 2048, %s1631_s3, [#allocation3], %s1338_s14, %s1338_s14, %s1339_s15  }
 0x21b   :  { %1334 = dma.done.wait [#allocation3], 2048  }
 0x21c   :  { %1335 = vsyncadd [#allocation3], 4294965248 }
 0x21d   :  { %1035 = vsyncpa [#allocation3], 1 }

</bundles_post_ra>
